<compile_context>
chip_gen: v5e
topology: v5e:2x2
jax: 0.10.0
libtpu: 0.0.40
codegen_flags: <defaults>
</compile_context>

<pallas_src>
import jax
import jax.numpy as jnp
from jax.experimental import pallas as pl
from jax.experimental.pallas import tpu as pltpu


def _identity_kernel(x_ref, o_ref):
    # Pure copy: RoIPooling.forward is `return x`.
    o_ref[...] = x_ref[...]


def _pick_row_tile(rows: int, row_bytes: int, target_block_bytes: int) -> int:
    """Pick a row tile so a (row_tile, cols) block is ~target_block_bytes.

    Prefers multiples of 32 sublanes (safe for f32/bf16/int8 packing), falls
    back to multiples of 8, and to the full row extent for tiny inputs.
    """
    if rows * row_bytes <= target_block_bytes:
        return rows  # whole row axis in one block (full-dim => no constraint)
    row_tile = max(1, target_block_bytes // row_bytes)
    if row_tile >= 32:
        row_tile = (row_tile // 32) * 32
    elif row_tile >= 8:
        row_tile = (row_tile // 8) * 8
    else:
        # A single row already exceeds the target; keep the sublane dim legal
        # (multiple of 8, or the full extent) and accept a larger block.
        row_tile = min(8, rows)
    return min(row_tile, rows)


def roi_pooling_forward(x: jax.Array) -> jax.Array:
    """Identity forward of RoIPooling as a Pallas TPU copy kernel.

    x: NCHW array.  Returns an array equal to x (same shape/dtype).
    """
    n, c, h, w = x.shape
    rows = n * c
    cols = h * w
    itemsize = jnp.dtype(x.dtype).itemsize
    row_bytes = cols * itemsize

    # ~2 MiB blocks: in + out double-buffered = 4x block bytes, inside every
    # generation's default scoped VMEM while big enough for the HBM roofline.
    target_block_bytes = 2 * 1024 * 1024
    row_tile = _pick_row_tile(rows, row_bytes, target_block_bytes)
    block_bytes = row_tile * row_bytes

    grid = (pl.cdiv(rows, row_tile),)

    # Contiguous, lane-dense 2-D view; each (row_tile, cols) block is one
    # contiguous stretch of HBM.
    x2d = x.reshape(rows, cols)

    in_spec = pl.BlockSpec((row_tile, cols), lambda i: (i, 0))
    out_spec = pl.BlockSpec((row_tile, cols), lambda i: (i, 0))

    # Only raise the scoped-VMEM limit if a single oversized row forces a
    # block bigger than the conservative default budget.
    compiler_kwargs = dict(dimension_semantics=("parallel",))
    vmem_needed = 4 * block_bytes  # in + out, double-buffered
    if vmem_needed > 16 * 1024 * 1024:
        compiler_kwargs["vmem_limit_bytes"] = min(
            vmem_needed + (4 << 20), 64 * 1024 * 1024
        )

    y2d = pl.pallas_call(
        _identity_kernel,
        out_shape=jax.ShapeDtypeStruct((rows, cols), x.dtype),
        grid_spec=pltpu.PrefetchScalarGridSpec(
            num_scalar_prefetch=0,
            grid=grid,
            in_specs=[in_spec],
            out_specs=out_spec,
        ),
        compiler_params=pltpu.CompilerParams(**compiler_kwargs),
        # Output aliases the input buffer: no extra allocation, and XLA may
        # elide the round-trip entirely when the operand is donated.
        input_output_aliases={0: 0},
        # Advertise this as a pure-memory op so XLA can overlap it with
        # neighboring compute in the detection graph.
        cost_estimate=pl.CostEstimate(
            flops=0,
            transcendentals=0,
            bytes_accessed=2 * x.size * itemsize,
        ),
    )(x2d)

    return y2d.reshape(n, c, h, w)


if __name__ == "__main__":
    key = jax.random.PRNGKey(0)
    # Small NCHW feature map consistent with what RoIPooling would receive.
    x = jax.random.normal(key, (2, 4, 16, 16), dtype=jnp.float32)

    y = roi_pooling_forward(x)
    y = jax.block_until_ready(y)

    assert y.shape == x.shape and y.dtype == x.dtype
    assert bool(jnp.all(y == x))

    print("KERNEL_OK")
</pallas_src>

<mosaic_0001>
module attributes {stable_mosaic.version = 11 : i64} {
  func.func @_identity_kernel(%arg0: i32, %arg1: memref<8x256xf32, #tpu.memory_space<vmem>>, %arg2: memref<8x256xf32, #tpu.memory_space<vmem>>) attributes {dimension_semantics = [#tpu.dimension_semantics<parallel>], iteration_bounds = array<i64: 1>, scalar_prefetch = 0 : i64, scratch_operands = 0 : i64, tpu.core_type = #tpu.core_type<tc>, window_params = [{transform_indices = @transform_0, window_bounds = array<i64: 8, 256>}, {transform_indices = @transform_1, window_bounds = array<i64: 8, 256>}]} {
    %c0 = arith.constant 0 : index
    %c0_0 = arith.constant 0 : index
    %0 = vector.load %arg1[%c0, %c0_0] : memref<8x256xf32, #tpu.memory_space<vmem>>, vector<8x256xf32>
    %c0_1 = arith.constant 0 : index
    %c0_2 = arith.constant 0 : index
    %1 = vector.load %arg2[%c0_1, %c0_2] : memref<8x256xf32, #tpu.memory_space<vmem>>, vector<8x256xf32>
    tpu.vector_store %arg2[%c0_1, %c0_2], %0 {strides = array<i32>} : memref<8x256xf32, #tpu.memory_space<vmem>>, vector<8x256xf32>,
    return
  }
  func.func @transform_0(%arg0: i32) -> (i32, i32) {
    %c0_i32 = arith.constant 0 : i32
    %c0_i32_0 = arith.constant 0 : i32
    return %arg0, %c0_i32 : i32, i32
  }
  func.func @transform_1(%arg0: i32) -> (i32, i32) {
    %c0_i32 = arith.constant 0 : i32
    %c0_i32_0 = arith.constant 0 : i32
    return %arg0, %c0_i32 : i32, i32
  }
}

</mosaic_0001>

<bundles_post_ra>
// kernel: tpu_custom_call.1
= control target key start
LH: loop header
LB: loop body
LE: loop exit
PB: predicated region body
PF: predicated region fallthrough
CT: control target
= control target key end

     0   :  { %6 = vsyncpa [#allocation3], 0  ;;  %s116_s0 = inlined_call_operand.hbm [shape: f32[8,256], index: 0, kind: input, shape index: {}, may-alias: {0,1}]   ;;  %s117_s1 = inlined_call_operand.hbm [shape: f32[8,256], index: 1, kind: output, shape index: {}, may-alias: {0,1}]  }
   0x1   :  { %7 = vsyncpa [#allocation4], 0  ;;  %s13_s8 = sshll.u32 %s116_s0, 4  ;;  %s98_s9 = smov [#allocation2]   ;;  %s14_s8 = int_to_ptr.hbm [resolvable:$true] %s13_s8 }
   0x2   :  { %s15_s10 = sshll.u32 %s98_s9, 4  ;;  %s16_s10 = int_to_ptr.vmem [resolvable:$true] %s15_s10 }
   0x3   :  { %18 = dma.hbm_to_vmem [thread:$0]  %s14_s8, 256, %s16_s10, [#allocation3]  }
   0x4   :  { %94 = dma.done.wait [#allocation3], 256  }
   0x5   :  { %95 = vsyncadd [#allocation3], 4294967040  ;;  %s99_s11 = smov [#allocation5]   ;;  %s34_s15 = sshll.u32 %s117_s1, 4  ;;  %v23_v0 = vld [vmem:[#allocation2] sm:$0xff]  ;;  %v24_v1 = vld [vmem:[#allocation2 + $0x8] sm:$0xff]  ;;  %s35_s15 = int_to_ptr.hbm [resolvable:$true] %s34_s15 }
   0x6   :  { %s32_s12 = sshll.u32 %s99_s11, 4  ;;  %25 = vst [vmem:[#allocation5] sm:$0xff] %v23_v0  ;;  %s33_s12 = int_to_ptr.vmem [resolvable:$true] %s32_s12 }
   0x7   :  { %26 = vst [vmem:[#allocation5 + $0x8] sm:$0xff] %v24_v1 }
   0x8   :  { %37 = dma.vmem_to_hbm [thread:$0]  %s33_s12, 256, %s35_s15, [#allocation4]  }
   0x9   :  { %96 = dma.done.wait [#allocation4], 256  }
   0xa   :  { %97 = vsyncadd [#allocation4], 4294967040 }
   0xb   :  { %42 = vsyncpa [#allocation3], 1 }
   0xc   :  { %43 = vsyncpa [#allocation4], 1 }

</bundles_post_ra>
